<compile_context>
chip_gen: v5e
topology: v5e:2x2
jax: 0.10.0
libtpu: 0.0.40
codegen_flags: <defaults>
</compile_context>

<pallas_src>
import jax
import jax.numpy as jnp
from jax import lax
from jax.experimental import pallas as pl
from jax.experimental.pallas import tpu as pltpu


# --------------------------------------------------------------------------
# Kernel 1: all layers resident in VMEM, single grid step, unrolled layer loop
# --------------------------------------------------------------------------
def _highway_resident_kernel(x_ref, wcat_ref, bcat_ref, o_ref):
    S = x_ref.shape[-1]
    L = wcat_ref.shape[0]
    wdtype = wcat_ref.dtype

    h0 = x_ref[...].astype(jnp.float32)               # [B, S] f32 carried state

    def layer(k, h):
        w = wcat_ref[k]                                # [S, 3S]  (bf16)
        b = bcat_ref[k]                                # [1, 3S]  (f32)
        z = jnp.dot(h.astype(wdtype), w,
                    preferred_element_type=jnp.float32) + b
        nonl = jnp.maximum(z[:, 0:S], 0.0)             # f = ReLU
        lin = z[:, S:2 * S]
        gate = jax.nn.sigmoid(z[:, 2 * S:3 * S])
        return lin + gate * (nonl - lin)               # == gate*nonl + (1-gate)*lin

    h = lax.fori_loop(0, L, layer, h0, unroll=True)
    o_ref[...] = h.astype(o_ref.dtype)


# --------------------------------------------------------------------------
# Kernel 2: grid=(L,) streaming path; hidden state carried in the output block
# --------------------------------------------------------------------------
def _highway_stream_kernel(x_ref, wcat_ref, bcat_ref, o_ref):
    S = x_ref.shape[-1]
    k = pl.program_id(0)

    @pl.when(k == 0)
    def _():
        o_ref[...] = x_ref[...].astype(o_ref.dtype)

    h = o_ref[...].astype(jnp.float32)                 # [B, S]
    w = wcat_ref[...]                                  # [S, 3S]  (leading layer dim squeezed)
    b = bcat_ref[...]                                  # [1, 3S]
    z = jnp.dot(h.astype(w.dtype), w,
                preferred_element_type=jnp.float32) + b
    nonl = jnp.maximum(z[:, 0:S], 0.0)                 # f = ReLU
    lin = z[:, S:2 * S]
    gate = jax.nn.sigmoid(z[:, 2 * S:3 * S])
    o_ref[...] = (lin + gate * (nonl - lin)).astype(o_ref.dtype)


# --------------------------------------------------------------------------
# Parameter packing (do once on the parameters, not per forward call)
# --------------------------------------------------------------------------
def pack_highway_params(wn, bn, wl, bl, wg, bg, weight_dtype=jnp.bfloat16):
    """w*: [L, S, S] in 'x @ W' orientation; b*: [L, S].

    Returns (wcat [L, S, 3S] weight_dtype, bcat [L, 1, 3S] f32) with column
    order (nonlinear | linear | gate).
    """
    L, S, _ = wn.shape
    wcat = jnp.concatenate([wn, wl, wg], axis=-1).astype(weight_dtype)
    bcat = jnp.concatenate([bn, bl, bg], axis=-1).astype(jnp.float32)
    return wcat, bcat.reshape(L, 1, 3 * S)


# --------------------------------------------------------------------------
# Forward wrapper
# --------------------------------------------------------------------------
def highway_forward(x, wcat, bcat, *, max_resident_weight_bytes=12 << 20):
    """x: [B, S]; wcat: [L, S, 3S]; bcat: [L, 1, 3S]."""
    B, S = x.shape
    L = wcat.shape[0]
    wbytes = jnp.dtype(wcat.dtype).itemsize
    xbytes = jnp.dtype(x.dtype).itemsize

    weight_total = L * (3 * S * S * wbytes + 3 * S * 4)
    # x + out blocks + a few [B, 3S] f32 temporaries
    io_bytes = 2 * B * S * xbytes + 4 * B * 3 * S * 4

    if weight_total <= max_resident_weight_bytes:
        # ---- fully resident path: one grid step, unrolled layer loop ----
        vmem_limit = int(min(max(2 * (weight_total + io_bytes) + (4 << 20),
                                 8 << 20), 48 << 20))
        return pl.pallas_call(
            _highway_resident_kernel,
            out_shape=jax.ShapeDtypeStruct((B, S), x.dtype),
            grid_spec=pltpu.PrefetchScalarGridSpec(
                num_scalar_prefetch=0,
                grid=(1,),
                in_specs=[
                    pl.BlockSpec((B, S), lambda i: (0, 0)),
                    pl.BlockSpec((L, S, 3 * S), lambda i: (0, 0, 0)),
                    pl.BlockSpec((L, 1, 3 * S), lambda i: (0, 0, 0)),
                ],
                out_specs=pl.BlockSpec((B, S), lambda i: (0, 0)),
            ),
            compiler_params=pltpu.CompilerParams(
                dimension_semantics=("arbitrary",),
                vmem_limit_bytes=vmem_limit),
        )(x, wcat, bcat)

    # ---- streaming path: layer loop is the grid, weights double-buffered ----
    per_layer = 3 * S * S * wbytes + 3 * S * 4
    vmem_limit = int(min(max(2 * per_layer + io_bytes + (4 << 20),
                             8 << 20), 48 << 20))
    return pl.pallas_call(
        _highway_stream_kernel,
        out_shape=jax.ShapeDtypeStruct((B, S), x.dtype),
        grid_spec=pltpu.PrefetchScalarGridSpec(
            num_scalar_prefetch=0,
            grid=(L,),
            in_specs=[
                pl.BlockSpec((B, S), lambda k: (0, 0)),
                pl.BlockSpec((pl.Squeezed(), S, 3 * S), lambda k: (k, 0, 0)),
                pl.BlockSpec((pl.Squeezed(), 1, 3 * S), lambda k: (k, 0, 0)),
            ],
            out_specs=pl.BlockSpec((B, S), lambda k: (0, 0)),
        ),
        compiler_params=pltpu.CompilerParams(
            dimension_semantics=("arbitrary",),
            vmem_limit_bytes=vmem_limit),
    )(x, wcat, bcat)


# --------------------------------------------------------------------------
# Pure-JAX f32 reference (matches the PyTorch module with f = ReLU)
# --------------------------------------------------------------------------
def highway_ref(x, wn, bn, wl, bl, wg, bg):
    h = x.astype(jnp.float32)
    for k in range(wn.shape[0]):
        nonl = jnp.maximum(h @ wn[k] + bn[k], 0.0)
        lin = h @ wl[k] + bl[k]
        gate = jax.nn.sigmoid(h @ wg[k] + bg[k])
        h = gate * nonl + (1.0 - gate) * lin
    return h.astype(x.dtype)


if __name__ == "__main__":
    batch, size, num_layers = 8, 128, 3

    key = jax.random.PRNGKey(0)
    ks = jax.random.split(key, 7)
    scale = 1.0 / jnp.sqrt(size)
    x = jax.random.normal(ks[0], (batch, size), dtype=jnp.float32)
    wn = jax.random.uniform(ks[1], (num_layers, size, size), jnp.float32, -scale, scale)
    bn = jax.random.uniform(ks[2], (num_layers, size), jnp.float32, -scale, scale)
    wl = jax.random.uniform(ks[3], (num_layers, size, size), jnp.float32, -scale, scale)
    bl = jax.random.uniform(ks[4], (num_layers, size), jnp.float32, -scale, scale)
    wg = jax.random.uniform(ks[5], (num_layers, size, size), jnp.float32, -scale, scale)
    bg = jax.random.uniform(ks[6], (num_layers, size), jnp.float32, -scale, scale)

    # Pack once (bf16 weights, f32 biases).
    wcat, bcat = pack_highway_params(wn, bn, wl, bl, wg, bg)

    ref = highway_ref(x, wn, bn, wl, bl, wg, bg)

    # Fast path: packed weights fully resident in VMEM, single grid step.
    out_resident = jax.block_until_ready(highway_forward(x, wcat, bcat))
    # General path: per-layer weight streaming (forced here for coverage).
    out_stream = jax.block_until_ready(
        highway_forward(x, wcat, bcat, max_resident_weight_bytes=0))

    assert out_resident.shape == (batch, size)
    assert out_stream.shape == (batch, size)
    # bf16 weights vs f32 reference -> looser tolerance.
    assert jnp.allclose(out_resident, ref, atol=2e-2, rtol=2e-2), "resident path mismatch"
    assert jnp.allclose(out_stream, ref, atol=2e-2, rtol=2e-2), "streaming path mismatch"

    print("KERNEL_OK")
</pallas_src>

<mosaic_0001>
module attributes {stable_mosaic.version = 11 : i64} {
  func.func @_highway_resident_kernel(%arg0: i32, %arg1: memref<8x128xf32, #tpu.memory_space<vmem>>, %arg2: memref<3x128x384xbf16, #tpu.memory_space<vmem>>, %arg3: memref<3x1x384xf32, #tpu.memory_space<vmem>>, %arg4: memref<8x128xf32, #tpu.memory_space<vmem>>) attributes {dimension_semantics = [#tpu.dimension_semantics<arbitrary>], iteration_bounds = array<i64: 1>, scalar_prefetch = 0 : i64, scratch_operands = 0 : i64, tpu.core_type = #tpu.core_type<tc>, window_params = [{pipeline_mode = #tpu.pipeline_mode<synchronous>, transform_indices = @transform_0, window_bounds = array<i64: 8, 128>}, {pipeline_mode = #tpu.pipeline_mode<synchronous>, transform_indices = @transform_1, window_bounds = array<i64: 3, 128, 384>}, {pipeline_mode = #tpu.pipeline_mode<synchronous>, transform_indices = @transform_2, window_bounds = array<i64: 3, 1, 384>}, {pipeline_mode = #tpu.pipeline_mode<synchronous>, transform_indices = @transform_3, window_bounds = array<i64: 8, 128>}]} {
    %c0 = arith.constant 0 : index
    %c0_0 = arith.constant 0 : index
    %0 = vector.load %arg1[%c0, %c0_0] : memref<8x128xf32, #tpu.memory_space<vmem>>, vector<8x128xf32>
    %c0_i32 = arith.constant 0 : i32
    %1 = arith.index_cast %c0_i32 : i32 to index
    %c0_1 = arith.constant 0 : index
    %c0_2 = arith.constant 0 : index
    %2 = vector.load %arg2[%1, %c0_1, %c0_2] : memref<3x128x384xbf16, #tpu.memory_space<vmem>>, vector<1x128x384xbf16>
    %3 = vector.shape_cast %2 : vector<1x128x384xbf16> to vector<128x384xbf16>
    %4 = arith.index_cast %c0_i32 : i32 to index
    %c0_3 = arith.constant 0 : index
    %c0_4 = arith.constant 0 : index
    %5 = vector.load %arg3[%4, %c0_3, %c0_4] : memref<3x1x384xf32, #tpu.memory_space<vmem>>, vector<1x1x384xf32>
    %6 = vector.shape_cast %5 : vector<1x1x384xf32> to vector<1x384xf32>
    %7 = arith.truncf %0 : vector<8x128xf32> to vector<8x128xbf16>
    %cst = arith.constant dense<0.000000e+00> : vector<8x384xf32>
    %8 = tpu.matmul %7, %3, %cst {dimension_numbers = #tpu.dot_dimension_numbers<[1], [0], [0], [1], [0, 0, 1, 1], [], []>} : vector<8x128xbf16>, vector<128x384xbf16>, vector<8x384xf32> -> vector<8x384xf32>
    %9 = vector.broadcast %6 : vector<1x384xf32> to vector<8x384xf32>
    %10 = arith.addf %8, %9 : vector<8x384xf32>
    %11 = vector.extract_strided_slice %10 {offsets = [0, 0], sizes = [8, 128], strides = [1, 1]} : vector<8x384xf32> to vector<8x128xf32>
    %cst_5 = arith.constant 0.000000e+00 : f32
    %12 = vector.broadcast %cst_5 : f32 to vector<8x128xf32>
    %13 = arith.maximumf %11, %12 : vector<8x128xf32>
    %14 = vector.extract_strided_slice %10 {offsets = [0, 128], sizes = [8, 128], strides = [1, 1]} : vector<8x384xf32> to vector<8x128xf32>
    %15 = vector.extract_strided_slice %10 {offsets = [0, 256], sizes = [8, 128], strides = [1, 1]} : vector<8x384xf32> to vector<8x128xf32>
    %16 = arith.negf %15 : vector<8x128xf32>
    %17 = math.exp %16 : vector<8x128xf32>
    %cst_6 = arith.constant 1.000000e+00 : f32
    %18 = vector.broadcast %cst_6 : f32 to vector<8x128xf32>
    %19 = arith.addf %18, %17 : vector<8x128xf32>
    %20 = arith.divf %18, %19 : vector<8x128xf32>
    %21 = arith.subf %13, %14 : vector<8x128xf32>
    %22 = arith.mulf %20, %21 : vector<8x128xf32>
    %23 = arith.addf %14, %22 : vector<8x128xf32>
    %c1_i32 = arith.constant 1 : i32
    %24 = arith.index_cast %c1_i32 : i32 to index
    %c0_7 = arith.constant 0 : index
    %c0_8 = arith.constant 0 : index
    %25 = vector.load %arg2[%24, %c0_7, %c0_8] : memref<3x128x384xbf16, #tpu.memory_space<vmem>>, vector<1x128x384xbf16>
    %26 = vector.shape_cast %25 : vector<1x128x384xbf16> to vector<128x384xbf16>
    %27 = arith.index_cast %c1_i32 : i32 to index
    %c0_9 = arith.constant 0 : index
    %c0_10 = arith.constant 0 : index
    %28 = vector.load %arg3[%27, %c0_9, %c0_10] : memref<3x1x384xf32, #tpu.memory_space<vmem>>, vector<1x1x384xf32>
    %29 = vector.shape_cast %28 : vector<1x1x384xf32> to vector<1x384xf32>
    %30 = arith.truncf %23 : vector<8x128xf32> to vector<8x128xbf16>
    %cst_11 = arith.constant dense<0.000000e+00> : vector<8x384xf32>
    %31 = tpu.matmul %30, %26, %cst_11 {dimension_numbers = #tpu.dot_dimension_numbers<[1], [0], [0], [1], [0, 0, 1, 1], [], []>} : vector<8x128xbf16>, vector<128x384xbf16>, vector<8x384xf32> -> vector<8x384xf32>
    %32 = vector.broadcast %29 : vector<1x384xf32> to vector<8x384xf32>
    %33 = arith.addf %31, %32 : vector<8x384xf32>
    %34 = vector.extract_strided_slice %33 {offsets = [0, 0], sizes = [8, 128], strides = [1, 1]} : vector<8x384xf32> to vector<8x128xf32>
    %cst_12 = arith.constant 0.000000e+00 : f32
    %35 = vector.broadcast %cst_12 : f32 to vector<8x128xf32>
    %36 = arith.maximumf %34, %35 : vector<8x128xf32>
    %37 = vector.extract_strided_slice %33 {offsets = [0, 128], sizes = [8, 128], strides = [1, 1]} : vector<8x384xf32> to vector<8x128xf32>
    %38 = vector.extract_strided_slice %33 {offsets = [0, 256], sizes = [8, 128], strides = [1, 1]} : vector<8x384xf32> to vector<8x128xf32>
    %39 = arith.negf %38 : vector<8x128xf32>
    %40 = math.exp %39 : vector<8x128xf32>
    %cst_13 = arith.constant 1.000000e+00 : f32
    %41 = vector.broadcast %cst_13 : f32 to vector<8x128xf32>
    %42 = arith.addf %41, %40 : vector<8x128xf32>
    %43 = arith.divf %41, %42 : vector<8x128xf32>
    %44 = arith.subf %36, %37 : vector<8x128xf32>
    %45 = arith.mulf %43, %44 : vector<8x128xf32>
    %46 = arith.addf %37, %45 : vector<8x128xf32>
    %c2_i32 = arith.constant 2 : i32
    %47 = arith.index_cast %c2_i32 : i32 to index
    %c0_14 = arith.constant 0 : index
    %c0_15 = arith.constant 0 : index
    %48 = vector.load %arg2[%47, %c0_14, %c0_15] : memref<3x128x384xbf16, #tpu.memory_space<vmem>>, vector<1x128x384xbf16>
    %49 = vector.shape_cast %48 : vector<1x128x384xbf16> to vector<128x384xbf16>
    %50 = arith.index_cast %c2_i32 : i32 to index
    %c0_16 = arith.constant 0 : index
    %c0_17 = arith.constant 0 : index
    %51 = vector.load %arg3[%50, %c0_16, %c0_17] : memref<3x1x384xf32, #tpu.memory_space<vmem>>, vector<1x1x384xf32>
    %52 = vector.shape_cast %51 : vector<1x1x384xf32> to vector<1x384xf32>
    %53 = arith.truncf %46 : vector<8x128xf32> to vector<8x128xbf16>
    %cst_18 = arith.constant dense<0.000000e+00> : vector<8x384xf32>
    %54 = tpu.matmul %53, %49, %cst_18 {dimension_numbers = #tpu.dot_dimension_numbers<[1], [0], [0], [1], [0, 0, 1, 1], [], []>} : vector<8x128xbf16>, vector<128x384xbf16>, vector<8x384xf32> -> vector<8x384xf32>
    %55 = vector.broadcast %52 : vector<1x384xf32> to vector<8x384xf32>
    %56 = arith.addf %54, %55 : vector<8x384xf32>
    %57 = vector.extract_strided_slice %56 {offsets = [0, 0], sizes = [8, 128], strides = [1, 1]} : vector<8x384xf32> to vector<8x128xf32>
    %cst_19 = arith.constant 0.000000e+00 : f32
    %58 = vector.broadcast %cst_19 : f32 to vector<8x128xf32>
    %59 = arith.maximumf %57, %58 : vector<8x128xf32>
    %60 = vector.extract_strided_slice %56 {offsets = [0, 128], sizes = [8, 128], strides = [1, 1]} : vector<8x384xf32> to vector<8x128xf32>
    %61 = vector.extract_strided_slice %56 {offsets = [0, 256], sizes = [8, 128], strides = [1, 1]} : vector<8x384xf32> to vector<8x128xf32>
    %62 = arith.negf %61 : vector<8x128xf32>
    %63 = math.exp %62 : vector<8x128xf32>
    %cst_20 = arith.constant 1.000000e+00 : f32
    %64 = vector.broadcast %cst_20 : f32 to vector<8x128xf32>
    %65 = arith.addf %64, %63 : vector<8x128xf32>
    %66 = arith.divf %64, %65 : vector<8x128xf32>
    %67 = arith.subf %59, %60 : vector<8x128xf32>
    %68 = arith.mulf %66, %67 : vector<8x128xf32>
    %69 = arith.addf %60, %68 : vector<8x128xf32>
    %c3_i32 = arith.constant 3 : i32
    %c0_21 = arith.constant 0 : index
    %c0_22 = arith.constant 0 : index
    %70 = vector.load %arg4[%c0_21, %c0_22] : memref<8x128xf32, #tpu.memory_space<vmem>>, vector<8x128xf32>
    tpu.vector_store %arg4[%c0_21, %c0_22], %69 {strides = array<i32>} : memref<8x128xf32, #tpu.memory_space<vmem>>, vector<8x128xf32>,
    return
  }
  func.func @transform_0(%arg0: i32) -> (i32, i32) {
    %c0_i32 = arith.constant 0 : i32
    %c0_i32_0 = arith.constant 0 : i32
    %c0_i32_1 = arith.constant 0 : i32
    return %c0_i32, %c0_i32_0 : i32, i32
  }
  func.func @transform_1(%arg0: i32) -> (i32, i32, i32) {
    %c0_i32 = arith.constant 0 : i32
    %c0_i32_0 = arith.constant 0 : i32
    %c0_i32_1 = arith.constant 0 : i32
    %c0_i32_2 = arith.constant 0 : i32
    return %c0_i32, %c0_i32_0, %c0_i32_1 : i32, i32, i32
  }
  func.func @transform_2(%arg0: i32) -> (i32, i32, i32) {
    %c0_i32 = arith.constant 0 : i32
    %c0_i32_0 = arith.constant 0 : i32
    %c0_i32_1 = arith.constant 0 : i32
    %c0_i32_2 = arith.constant 0 : i32
    return %c0_i32, %c0_i32_0, %c0_i32_1 : i32, i32, i32
  }
  func.func @transform_3(%arg0: i32) -> (i32, i32) {
    %c0_i32 = arith.constant 0 : i32
    %c0_i32_0 = arith.constant 0 : i32
    %c0_i32_1 = arith.constant 0 : i32
    return %c0_i32, %c0_i32_0 : i32, i32
  }
}

</mosaic_0001>

<bundles_post_ra>
// kernel: tpu_custom_call.1
= control target key start
LH: loop header
LB: loop body
LE: loop exit
PB: predicated region body
PF: predicated region fallthrough
CT: control target
= control target key end

     0   :  { %8 = vsyncpa [#allocation3], 0  ;;  %s1302_s0 = inlined_call_operand.hbm [shape: f32[8,128], index: 0, kind: input, shape index: {}]   ;;  %s1303_s1 = inlined_call_operand.hbm [shape: bf16[3,128,384], index: 1, kind: input, shape index: {}]   ;;  %s1304_s2 = inlined_call_operand.hbm [shape: f32[3,1,384], index: 2, kind: input, shape index: {}]   ;;  %s1305_s3 = inlined_call_operand.hbm [shape: f32[8,128], index: 3, kind: output, shape index: {}]  }
   0x1   :  { %9 = vsyncpa [#allocation6], 0  ;;  %s26_s14 = sshll.u32 %s1303_s1, 4  ;;  %s27_s14 = int_to_ptr.hbm [resolvable:$true] %s26_s14 }
   0x2   :  { %10 = vsyncpa [#allocation4], 0  ;;  %s1262_s15 = smov [#allocation5]   ;;  %s16_s19 = sshll.u32 %s1302_s0, 4  ;;  %s17_s19 = int_to_ptr.hbm [resolvable:$true] %s16_s19 }
   0x3   :  { %s28_s16 = sshll.u32 %s1262_s15, 4  ;;  %s1263_s20 = smov 192   ;;  %s29_s16 = int_to_ptr.vmem [resolvable:$true] %s28_s16 }
   0x4   :  { %s1264_s21 = smov 12   ;;  %s1265_s22 = smov [#allocation2]  }
   0x5   :  { %34 = dma.hbm_to_vmem [thread:$0]  %s27_s14, 9216, %s29_s16, [#allocation6], %s1263_s20, %s1263_s20, %s1264_s21  }
   0x6   :  { %s18_s23 = sshll.u32 %s1265_s22, 4  ;;  %s39_s26 = sshll.u32 %s1304_s2, 4  ;;  %s19_s23 = int_to_ptr.vmem [resolvable:$true] %s18_s23  ;;  %s40_s26 = int_to_ptr.hbm [resolvable:$true] %s39_s26 }
   0x7   :  { %21 = dma.hbm_to_vmem [thread:$0]  %s17_s19, 128, %s19_s23, [#allocation3]  }
   0x8   :  { %s1266_s1 = smov [#allocation7]   ;;  %s1267_s28 = smov 48  }
   0x9   :  { %s41_s27 = sshll.u32 %s1266_s1, 4  ;;  %s1268_s29 = smov 3   ;;  %s42_s27 = int_to_ptr.vmem [resolvable:$true] %s41_s27 }
   0xa   :  { %47 = dma.hbm_to_vmem [thread:$0]  %s40_s26, 144, %s42_s27, [#allocation6], %s1267_s28, %s1267_s28, %s1268_s29  }
   0xb   :  { %1256 = dma.done.wait [#allocation3], 128  }
   0xc   :  { %1257 = vsyncadd [#allocation3], 4294967168 }
   0xd   :  { %1258 = dma.done.wait [#allocation6], 9360  }
   0xe   :  { %1259 = vsyncadd [#allocation6], 4294957936  ;;  %v871_v0 = vld [vmem:[#allocation5 + $0xb0] sm:$0xf]  ;;  %v1091_v1 = vld [vmem:[#allocation5 + $0xb8] sm:$0xf0] }
   0xf   :  { %v859_v2 = vld [vmem:[#allocation5 + $0x98] sm:$0xf]  ;;  %v872_v3 = vor.u32 %v1091_v1, %v871_v0  ;;  %v1088_v4 = vld [vmem:[#allocation5 + $0xa0] sm:$0xf0]  ;;  %v847_v6 = vld [vmem:[#allocation5 + $0x80] sm:$0xf] }
  0x10   :  { %v860_v5 = vor.u32 %v1088_v4, %v859_v2  ;;  %v1085_v7 = vld [vmem:[#allocation5 + $0x88] sm:$0xf0]  ;;  %v863_v8 = vld [vmem:[#allocation5 + $0xa8] sm:$0xf]  ;;  %v1090_v9 = vld [vmem:[#allocation5 + $0xb0] sm:$0xf0] }
  0x11   :  { %256 = vmatpush.bf16.msra.mxu2 %v872_v3  ;;  %v1089_v10 = vld [vmem:[#allocation5 + $0xac] sm:$0xf]  ;;  %v864_v11 = vor.u32 %v1090_v9, %v863_v8  ;;  %v865_v12 = vld [vmem:[#allocation5 + $0xb4] sm:$0xf0]  ;;  %v851_v14 = vld [vmem:[#allocation5 + $0x90] sm:$0xf]  ;;  %v848_v17 = vor.u32 %v1085_v7, %v847_v6 }
  0x12   :  { %v868_v13 = vor.u32 %v1089_v10, %v865_v12  ;;  %v1087_v15 = vld [vmem:[#allocation5 + $0x98] sm:$0xf0]  ;;  %v1086_v16 = vld [vmem:[#allocation5 + $0x94] sm:$0xf]  ;;  %v835_v18 = vld [vmem:[#allocation5 + $0x68] sm:$0xf] }
  0x13   :  { %230 = vmatpush.bf16.msra.mxu0 %v864_v11  ;;  %v852_v19 = vor.u32 %v1087_v15, %v851_v14  ;;  %v853_v20 = vld [vmem:[#allocation5 + $0x9c] sm:$0xf0]  ;;  %v1082_v21 = vld [vmem:[#allocation5 + $0x70] sm:$0xf0]  ;;  %v839_v23 = vld [vmem:[#allocation5 + $0x78] sm:$0xf] }
  0x14   :  { %243 = vmatpush.bf16.msra.mxu1 %v868_v13  ;;  %v856_v22 = vor.u32 %v1086_v16, %v853_v20  ;;  %v1084_v24 = vld [vmem:[#allocation5 + $0x80] sm:$0xf0]  ;;  %v1083_v25 = vld [vmem:[#allocation5 + $0x7c] sm:$0xf]  ;;  %v841_v26 = vld [vmem:[#allocation5 + $0x84] sm:$0xf0]  ;;  %v836_v27 = vor.u32 %v1082_v21, %v835_v18 }
  0x15   :  { %257 = vmatpush.bf16.msra.mxu2 %v860_v5  ;;  %v823_v28 = vld [vmem:[#allocation5 + $0x50] sm:$0xf]  ;;  %v840_v29 = vor.u32 %v1084_v24, %v839_v23  ;;  %v1079_v30 = vld [vmem:[#allocation5 + $0x58] sm:$0xf0]  ;;  %v844_v31 = vor.u32 %v1083_v25, %v841_v26  ;;  %v827_v32 = vld [vmem:[#allocation5 + $0x60] sm:$0xf] }
  0x16   :  { %v1081_v33 = vld [vmem:[#allocation5 + $0x68] sm:$0xf0]  ;;  %v1080_v34 = vld [vmem:[#allocation5 + $0x64] sm:$0xf]  ;;  %v829_v35 = vld [vmem:[#allocation5 + $0x6c] sm:$0xf0]  ;;  %v824_v36 = vor.u32 %v1079_v30, %v823_v28 }
  0x17   :  { %231 = vmatpush.bf16.msra.mxu0 %v852_v19  ;;  %v811_v37 = vld [vmem:[#allocation5 + $0x38] sm:$0xf]  ;;  %v828_v38 = vor.u32 %v1081_v33, %v827_v32  ;;  %v1076_v39 = vld [vmem:[#allocation5 + $0x40] sm:$0xf0]  ;;  %v832_v40 = vor.u32 %v1080_v34, %v829_v35  ;;  %v815_v41 = vld [vmem:[#allocation5 + $0x48] sm:$0xf] }
  0x18   :  { %244 = vmatpush.bf16.msra.mxu1 %v856_v22  ;;  %v1078_v42 = vld [vmem:[#allocation5 + $0x50] sm:$0xf0]  ;;  %v1077_v43 = vld [vmem:[#allocation5 + $0x4c] sm:$0xf]  ;;  %v817_v44 = vld [vmem:[#allocation5 + $0x54] sm:$0xf0]  ;;  %v812_v45 = vor.u32 %v1076_v39, %v811_v37 }
  0x19   :  { %258 = vmatpush.bf16.msra.mxu2 %v848_v17  ;;  %v799_v46 = vld [vmem:[#allocation5 + $0x20] sm:$0xf]  ;;  %v816_v47 = vor.u32 %v1078_v42, %v815_v41  ;;  %v1073_v48 = vld [vmem:[#allocation5 + $0x28] sm:$0xf0]  ;;  %v820_v49 = vor.u32 %v1077_v43, %v817_v44  ;;  %v803_v50 = vld [vmem:[#allocation5 + $0x30] sm:$0xf] }
  0x1a   :  { %v1075_v51 = vld [vmem:[#allocation5 + $0x38] sm:$0xf0]  ;;  %v1074_v52 = vld [vmem:[#allocation5 + $0x34] sm:$0xf]  ;;  %v805_v53 = vld [vmem:[#allocation5 + $0x3c] sm:$0xf0]  ;;  %v800_v54 = vor.u32 %v1073_v48, %v799_v46 }
  0x1b   :  { %232 = vmatpush.bf16.msra.mxu0 %v840_v29  ;;  %v787_v55 = vld [vmem:[#allocation5 + $0x8] sm:$0xf]  ;;  %v804_v56 = vor.u32 %v1075_v51, %v803_v50  ;;  %v1070_v57 = vld [vmem:[#allocation5 + $0x10] sm:$0xf0]  ;;  %v808_v58 = vor.u32 %v1074_v52, %v805_v53  ;;  %v791_v59 = vld [vmem:[#allocation5 + $0x18] sm:$0xf] }
  0x1c   :  { %245 = vmatpush.bf16.msra.mxu1 %v844_v31  ;;  %v1072_v60 = vld [vmem:[#allocation5 + $0x20] sm:$0xf0]  ;;  %v1071_v61 = vld [vmem:[#allocation5 + $0x1c] sm:$0xf]  ;;  %v793_v62 = vld [vmem:[#allocation5 + $0x24] sm:$0xf0]  ;;  %v788_v63 = vor.u32 %v1070_v57, %v787_v55 }
  0x1d   :  { %259 = vmatpush.bf16.msra.mxu2 %v836_v27  ;;  %v60_v0 = vld [vmem:[#allocation2] sm:$0xff]  ;;  %v792_v1 = vor.u32 %v1072_v60, %v791_v59  ;;  %v796_v2 = vor.u32 %v1071_v61, %v793_v62  ;;  %v779_v3 = vld [vmem:[#allocation5] sm:$0xf]  ;;  %v1069_v4 = vld [vmem:[#allocation5 + $0x8] sm:$0xf0]  ;;  %s1269_s0 = smov [#allocation8]  }
  0x1e   :  { %v1068_v5 = vld [vmem:[#allocation5 + $0x4] sm:$0xf]  ;;  %v781_v6 = vld [vmem:[#allocation5 + $0xc] sm:$0xf0]  ;;  %v94_v7 = vpack.c.bf16 %v60_v0, %v60_v0  ;;  %v780_v8 = vor.u32 %v1069_v4, %v779_v3  ;;  %v960_v10 = vld [vmem:[#allocation5 + $0x168] sm:$0xf] }
  0x1f   :  { %233 = vmatpush.bf16.msra.mxu0 %v828_v38  ;;  %v784_v9 = vor.u32 %v1068_v5, %v781_v6  ;;  %v1114_v11 = vld [vmem:[#allocation5 + $0x170] sm:$0xf0]  ;;  %v1113_v12 = vld [vmem:[#allocation5 + $0x16c] sm:$0xf]  ;;  %v962_v14 = vld [vmem:[#allocation5 + $0x174] sm:$0xf0] }
  0x20   :  { %246 = vmatpush.bf16.msra.mxu1 %v832_v40  ;;  %v961_v13 = vor.u32 %v1114_v11, %v960_v10  ;;  %v968_v15 = vld [vmem:[#allocation5 + $0x170] sm:$0xf]  ;;  %v1115_v16 = vld [vmem:[#allocation5 + $0x178] sm:$0xf0]  ;;  %v965_v17 = vor.u32 %v1113_v12, %v962_v14  ;;  %v1110_v21 = vld [vmem:[#allocation5 + $0x154] sm:$0xf] }
  0x21   :  { %260 = vmatpush.bf16.msra.mxu2 %v824_v36  ;;  %v969_v18 = vor.u32 %v1115_v16, %v968_v15  ;;  %v948_v19 = vld [vmem:[#allocation5 + $0x150] sm:$0xf]  ;;  %v1111_v20 = vld [vmem:[#allocation5 + $0x158] sm:$0xf0]  ;;  %v950_v23 = vld [vmem:[#allocation5 + $0x15c] sm:$0xf0] }
  0x22   :  { %463 = vmatpush.bf16.msra.mxu3 %v961_v13  ;;  %v949_v22 = vor.u32 %v1111_v20, %v948_v19  ;;  %v956_v24 = vld [vmem:[#allocation5 + $0x158] sm:$0xf]  ;;  %v1112_v25 = vld [vmem:[#allocation5 + $0x160] sm:$0xf0]  ;;  %v953_v26 = vor.u32 %v1110_v21, %v950_v23  ;;  %v1107_v30 = vld [vmem:[#allocation5 + $0x13c] sm:$0xf] }
  0x23   :  { %234 = vmatpush.bf16.msra.mxu0 %v816_v47  ;;  %v957_v27 = vor.u32 %v1112_v25, %v956_v24  ;;  %v936_v28 = vld [vmem:[#allocation5 + $0x138] sm:$0xf]  ;;  %v1108_v29 = vld [vmem:[#allocation5 + $0x140] sm:$0xf0]  ;;  %v938_v32 = vld [vmem:[#allocation5 + $0x144] sm:$0xf0] }
  0x24   :  { %247 = vmatpush.bf16.msra.mxu1 %v820_v49  ;;  %v937_v31 = vor.u32 %v1108_v29, %v936_v28  ;;  %v944_v33 = vld [vmem:[#allocation5 + $0x140] sm:$0xf]  ;;  %v1109_v34 = vld [vmem:[#allocation5 + $0x148] sm:$0xf0]  ;;  %v941_v35 = vor.u32 %v1107_v30, %v938_v32  ;;  %v1104_v39 = vld [vmem:[#allocation5 + $0x124] sm:$0xf] }
  0x25   :  { %261 = vmatpush.bf16.msra.mxu2 %v812_v45  ;;  %v945_v36 = vor.u32 %v1109_v34, %v944_v33  ;;  %v924_v37 = vld [vmem:[#allocation5 + $0x120] sm:$0xf]  ;;  %v1105_v38 = vld [vmem:[#allocation5 + $0x128] sm:$0xf0]  ;;  %v926_v41 = vld [vmem:[#allocation5 + $0x12c] sm:$0xf0] }
  0x26   :  { %464 = vmatpush.bf16.msra.mxu3 %v949_v22  ;;  %v925_v40 = vor.u32 %v1105_v38, %v924_v37  ;;  %v932_v42 = vld [vmem:[#allocation5 + $0x128] sm:$0xf]  ;;  %v1106_v43 = vld [vmem:[#allocation5 + $0x130] sm:$0xf0]  ;;  %v929_v44 = vor.u32 %v1104_v39, %v926_v41  ;;  %v1101_v48 = vld [vmem:[#allocation5 + $0x10c] sm:$0xf] }
  0x27   :  { %235 = vmatpush.bf16.msra.mxu0 %v804_v56  ;;  %v933_v45 = vor.u32 %v1106_v43, %v932_v42  ;;  %v912_v46 = vld [vmem:[#allocation5 + $0x108] sm:$0xf]  ;;  %v1102_v47 = vld [vmem:[#allocation5 + $0x110] sm:$0xf0]  ;;  %v914_v50 = vld [vmem:[#allocation5 + $0x114] sm:$0xf0] }
  0x28   :  { %248 = vmatpush.bf16.msra.mxu1 %v808_v58  ;;  %v913_v49 = vor.u32 %v1102_v47, %v912_v46  ;;  %v920_v51 = vld [vmem:[#allocation5 + $0x110] sm:$0xf]  ;;  %v1103_v52 = vld [vmem:[#allocation5 + $0x118] sm:$0xf0]  ;;  %v917_v53 = vor.u32 %v1101_v48, %v914_v50  ;;  %v1098_v57 = vld [vmem:[#allocation5 + $0xf4] sm:$0xf] }
  0x29   :  { %262 = vmatpush.bf16.msra.mxu2 %v800_v54  ;;  %v921_v54 = vor.u32 %v1103_v52, %v920_v51  ;;  %v900_v55 = vld [vmem:[#allocation5 + $0xf0] sm:$0xf]  ;;  %v1099_v56 = vld [vmem:[#allocation5 + $0xf8] sm:$0xf0]  ;;  %v902_v59 = vld [vmem:[#allocation5 + $0xfc] sm:$0xf0] }
  0x2a   :  { %465 = vmatpush.bf16.msra.mxu3 %v937_v31  ;;  %v901_v58 = vor.u32 %v1099_v56, %v900_v55  ;;  %v908_v60 = vld [vmem:[#allocation5 + $0xf8] sm:$0xf]  ;;  %v1100_v61 = vld [vmem:[#allocation5 + $0x100] sm:$0xf0]  ;;  %v905_v62 = vor.u32 %v1098_v57, %v902_v59  ;;  %v93_v0 = vld [vmem:[#allocation7] sm:$0x7] }
  0x2b   :  { %236 = vmatpush.bf16.msra.mxu0 %v792_v1  ;;  %v888_v1 = vld [vmem:[#allocation5 + $0xd8] sm:$0xf]  ;;  %v1095_v3 = vld [vmem:[#allocation5 + $0xdc] sm:$0xf]  ;;  %v890_v5 = vld [vmem:[#allocation5 + $0xe4] sm:$0xf0] }
  0x2c   :  { %249 = vmatpush.bf16.msra.mxu1 %v796_v2  ;;  %v1096_v2 = vld [vmem:[#allocation5 + $0xe0] sm:$0xf0]  ;;  %v896_v6 = vld [vmem:[#allocation5 + $0xe0] sm:$0xf]  ;;  %v1093_v14 = vld [vmem:[#allocation5 + $0xc8] sm:$0xf0] }
  0x2d   :  { %263 = vmatpush.bf16.msra.mxu2 %v788_v63  ;;  %v909_v63 = vor.u32 %v1100_v61, %v908_v60  ;;  %v889_v4 = vor.u32 %v1096_v2, %v888_v1  ;;  %v876_v13 = vld [vmem:[#allocation5 + $0xc0] sm:$0xf]  ;;  %v1092_v15 = vld [vmem:[#allocation5 + $0xc4] sm:$0xf]  ;;  %v884_v19 = vld [vmem:[#allocation5 + $0xc8] sm:$0xf] }
  0x2e   :  { %466 = vmatpush.bf16.msra.mxu3 %v925_v40  ;;  %v1094_v20 = vld [vmem:[#allocation5 + $0xd0] sm:$0xf0]  ;;  %v96_v30 = vperm.slane %v93_v0, 0  ;;  %v97_v32 = vperm.slane %v93_v0, 1  ;;  %v1137_v51 = vld [vmem:[#allocation5 + $0x22c] sm:$0xf] }
  0x2f   :  { %237 = vmatpush.bf16.msra.mxu0 %v780_v8  ;;  %v98_v8 = vperm.slane %v93_v0, 2  ;;  %v885_v23 = vor.u32 %v1094_v20, %v884_v19  ;;  %v1138_v50 = vld [vmem:[#allocation5 + $0x230] sm:$0xf0]  ;;  %v1139_v55 = vld [vmem:[#allocation5 + $0x238] sm:$0xf0]  ;;  %s764_s2 = sshll.u32 %s1269_s0, 4  ;;  %s765_s2 = int_to_ptr.vmem [resolvable:$true] %s764_s2 }
  0x30   :  { %264 = vmatmul.bf16.vlgmr.msra.gmra.mxu2 %v94_v7  ;;  %250 = vmatpush.bf16.msra.mxu1 %v784_v9  ;;  %v893_v9 = vor.u32 %v1095_v3, %v890_v5  ;;  %v1135_v59 = vld [vmem:[#allocation5 + $0x218] sm:$0xf0]  ;;  %v1134_v60 = vld [vmem:[#allocation5 + $0x214] sm:$0xf]  ;;  %v1136_v0 = vld [vmem:[#allocation5 + $0x220] sm:$0xf0] }
  0x31   :  { %v1033_v3 = vld [vmem:[#allocation5 + $0x1f8] sm:$0xf]  ;;  %v1131_v5 = vld [vmem:[#allocation5 + $0x1fc] sm:$0xf]  ;;  %s766_s5 = sshll.u32 %s1305_s3, 4  ;;  %s767_s5 = int_to_ptr.hbm [resolvable:$true] %s766_s5 }
  0x32   :  { %238 = vmatmul.bf16.vlgmr.msra.gmra.mxu0 %v94_v7  ;;  %467 = vmatpush.bf16.msra.mxu3 %v913_v49  ;;  %v1057_v49 = vld [vmem:[#allocation5 + $0x228] sm:$0xf] }
  0x33   :  { %251 = vmatmul.bf16.vlgmr.msra.gmra.mxu1 %v94_v7  ;;  %476 = vmatpush.bf16.msrb.mxu0 %v965_v17  ;;  %v1097_v7 = vld [vmem:[#allocation5 + $0xe8] sm:$0xf0]  ;;  %v877_v17 = vor.u32 %v1093_v14, %v876_v13  ;;  %v1058_v52 = vor.u32 %v1138_v50, %v1057_v49  ;;  %v1128_v14 = vld [vmem:[#allocation5 + $0x1e4] sm:$0xf] }
  0x34   :  { %489 = vmatpush.bf16.msrb.mxu1 %v969_v18  ;;  %v897_v10 = vor.u32 %v1097_v7, %v896_v6  ;;  %v878_v18 = vld [vmem:[#allocation5 + $0xcc] sm:$0xf0]  ;;  %v1035_v7 = vld [vmem:[#allocation5 + $0x204] sm:$0xf0]  ;;  %v1129_v13 = vld [vmem:[#allocation5 + $0x1e8] sm:$0xf0] }
  0x35   :  { %v881_v22 = vor.u32 %v1092_v15, %v878_v18  ;;  %696 = vmatpush.bf16.msrb.mxu2 %v1058_v52  ;;  %v1130_v18 = vld [vmem:[#allocation5 + $0x1f0] sm:$0xf0]  ;;  %v1117_v52 = vld [vmem:[#allocation5 + $0x188] sm:$0xf0] }
  0x36   :  { %468 = vmatpush.bf16.msra.mxu3 %v901_v58  ;;  %v1045_v58 = vld [vmem:[#allocation5 + $0x210] sm:$0xf] }
  0x37   :  { %477 = vmatpush.bf16.msrb.mxu0 %v953_v26  ;;  %v1046_v61 = vor.u32 %v1135_v59, %v1045_v58  ;;  %v1118_v58 = vld [vmem:[#allocation5 + $0x190] sm:$0xf0] }
  0x38   :  { %490 = vmatpush.bf16.msrb.mxu1 %v957_v27 }
  0x39   :  { %697 = vmatpush.bf16.msrb.mxu2 %v1046_v61 }
  0x3a   :  { %469 = vmatpush.bf16.msra.mxu3 %v889_v4  ;;  %v1132_v4 = vld [vmem:[#allocation5 + $0x200] sm:$0xf0] }
  0x3b   :  { %478 = vmatpush.bf16.msrb.mxu0 %v941_v35  ;;  %v1034_v6 = vor.u32 %v1132_v4, %v1033_v3 }
  0x3c   :  { %491 = vmatpush.bf16.msrb.mxu1 %v945_v36 }
  0x3d   :  { %698 = vmatpush.bf16.msrb.mxu2 %v1034_v6 }
  0x3e   :  { %470 = vmatpush.bf16.msra.mxu3 %v877_v17  ;;  %v1029_v17 = vld [vmem:[#allocation5 + $0x1e8] sm:$0xf] }
  0x3f   :  { %479 = vmatpush.bf16.msrb.mxu0 %v929_v44  ;;  %v1030_v20 = vor.u32 %v1130_v18, %v1029_v17 }
  0x40   :  { %492 = vmatpush.bf16.msrb.mxu1 %v933_v45 }
  0x43   :  { %480 = vmatpush.bf16.msrb.mxu0 %v917_v53  ;;  %v1059_v53 = vld [vmem:[#allocation5 + $0x234] sm:$0xf0] }
  0x44   :  { %493 = vmatpush.bf16.msrb.mxu1 %v921_v54  ;;  %v1065_v54 = vld [vmem:[#allocation5 + $0x230] sm:$0xf]  ;;  %v1062_v56 = vor.u32 %v1137_v51, %v1059_v53  ;;  %v973_v51 = vld [vmem:[#allocation5 + $0x180] sm:$0xf]  ;;  %v1116_v53 = vld [vmem:[#allocation5 + $0x184] sm:$0xf] }
  0x45   :  { %v1066_v57 = vor.u32 %v1139_v55, %v1065_v54  ;;  %v974_v55 = vor.u32 %v1117_v52, %v973_v51 }
  0x46   :  { %709 = vmatpush.bf16.msrb.mxu3 %v1062_v56  ;;  %v975_v56 = vld [vmem:[#allocation5 + $0x18c] sm:$0xf0] }
  0x47   :  { %481 = vmatpush.bf16.msrb.mxu0 %v905_v62  ;;  %v1047_v62 = vld [vmem:[#allocation5 + $0x21c] sm:$0xf0] }
  0x48   :  { %494 = vmatpush.bf16.msrb.mxu1 %v909_v63  ;;  %v1053_v63 = vld [vmem:[#allocation5 + $0x218] sm:$0xf]  ;;  %v1050_v1 = vor.u32 %v1134_v60, %v1047_v62  ;;  %v978_v60 = vor.u32 %v1116_v53, %v975_v56 }
  0x49   :  { %v1054_v2 = vor.u32 %v1136_v0, %v1053_v63 }
  0x4a   :  { %710 = vmatpush.bf16.msrb.mxu3 %v1050_v1 }
  0x4b   :  { %482 = vmatpush.bf16.msrb.mxu0 %v893_v9  ;;  %v1133_v9 = vld [vmem:[#allocation5 + $0x208] sm:$0xf0] }
  0x4c   :  { %495 = vmatpush.bf16.msrb.mxu1 %v897_v10  ;;  %v1038_v10 = vor.u32 %v1131_v5, %v1035_v7 }
  0x4e   :  { %711 = vmatpush.bf16.msrb.mxu3 %v1038_v10 }
  0x4f   :  { %483 = vmatpush.bf16.msrb.mxu0 %v881_v22  ;;  %v1126_v22 = vld [vmem:[#allocation5 + $0x1d0] sm:$0xf0] }
  0x50   :  { %496 = vmatpush.bf16.msrb.mxu1 %v885_v23  ;;  %v1125_v23 = vld [vmem:[#allocation5 + $0x1cc] sm:$0xf] }
  0x53   :  { %722 = vmatpush.bf16.msra.mxu0 %v1066_v57  ;;  %v981_v57 = vld [vmem:[#allocation5 + $0x188] sm:$0xf] }
  0x54   :  { %v982_v61 = vor.u32 %v1118_v58, %v981_v57 }
  0x57   :  { %723 = vmatpush.bf16.msra.mxu0 %v1054_v2 }
  0xaf   :  { %v239_v11 = vpop.f32.mrf.mxu0 }
  0xb0   :  { %v252_v12 = vpop.f32.mrf.mxu1  ;;  %v240_v31 = vadd.f32 %v239_v11, %v96_v30  ;;  %v997_v30 = vld [vmem:[#allocation5 + $0x1b0] sm:$0xf] }
  0xb1   :  { %v253_v36 = vadd.f32 %v252_v12, %v97_v32  ;;  %v1021_v12 = vld [vmem:[#allocation5 + $0x1e0] sm:$0xf]  ;;  %v1122_v32 = vld [vmem:[#allocation5 + $0x1b4] sm:$0xf] }
  0xb2   :  { %v269_v35 = vmax.f32 %v240_v31, 0.0  ;;  %v1022_v15 = vor.u32 %v1129_v13, %v1021_v12  ;;  %v1123_v31 = vld [vmem:[#allocation5 + $0x1b8] sm:$0xf0] }
  0xb3   :  { %v265_v16 = vpop.f32.mrf.mxu2 }
  0xb4   :  { %v266_v21 = vadd.f32 %v265_v16, %v98_v8  ;;  %v289_v42 = vsub.f32 %v269_v35, %v253_v36  ;;  %v1041_v8 = vld [vmem:[#allocation5 + $0x200] sm:$0xf]  ;;  %v1023_v16 = vld [vmem:[#allocation5 + $0x1ec] sm:$0xf0]  ;;  %699 = vmatpush.bf16.msrb.mxu2 %v1022_v15  ;;  %v1005_v35 = vld [vmem:[#allocation5 + $0x1b8] sm:$0xf] }
  0xb5   :  { %v1042_v11 = vor.u32 %v1133_v9, %v1041_v8  ;;  %v1026_v19 = vor.u32 %v1128_v14, %v1023_v16 }
  0xb6   :  { %v873_v24 = vmul.f32 -1.442695, %v266_v21  ;;  %v1009_v21 = vld [vmem:[#allocation5 + $0x1c8] sm:$0xf] }
  0xb7   :  { %v241_v25 = vpop.f32.mrf.mxu0  ;;  %724 = vmatpush.bf16.msra.mxu0 %v1042_v11  ;;  %712 = vmatpush.bf16.msrb.mxu3 %v1026_v19 }
  0xb8   :  { %1148 = vpow2.f32 %v873_v24  ;;  %v254_v26 = vpop.f32.mrf.mxu1  ;;  %v1010_v24 = vor.u32 %v1126_v22, %v1009_v21  ;;  %v1011_v25 = vld [vmem:[#allocation5 + $0x1d4] sm:$0xf0] }
  0xb9   :  { %v1017_v26 = vld [vmem:[#allocation5 + $0x1d0] sm:$0xf] }
  0xba   :  { %700 = vmatpush.bf16.msrb.mxu2 %v1010_v24  ;;  %v559_v24 = vld [vmem:[#allocation7 + $0x6] sm:$0x7] }
  0xbb   :  { %v267_v27 = vpop.f32.mrf.mxu2  ;;  %725 = vmatpush.bf16.msra.mxu0 %v1030_v20 }
  0xbc   :  { %v1127_v27 = vld [vmem:[#allocation5 + $0x1d8] sm:$0xf0] }
  0xbe   :  { %v1149_v28 = vpop.eup %1148 }
  0xbf   :  { %v273_v29 = vadd.f32 1.0, %v1149_v28  ;;  %v1014_v28 = vor.u32 %v1125_v23, %v1011_v25  ;;  %v564_v25 = vperm.slane %v559_v24, 2 }
  0xc1   :  { %1150 = vrcp.f32 %v273_v29  ;;  %v285_v38 = vand.u32 2147483648, %v273_v29  ;;  %v283_v40 = vand.u32 2147483647, %v273_v29  ;;  %vm279_vm1 = vweird.f32 %v273_v29  ;;  %713 = vmatpush.bf16.msrb.mxu3 %v1014_v28 }
  0xc3   :  { %v286_v43 = vor.u32 1.1754944e-38, %v285_v38  ;;  %vm284_vm3 = vcmp.eq.f32.partialorder %v283_v40, 8.507059e+37  ;;  %v985_v40 = vld [vmem:[#allocation5 + $0x198] sm:$0xf] }
  0xc7   :  { %v1151_v33 = vpop.eup %1150 }
  0xc8   :  { %v275_v34 = vmul.f32 %v1151_v33, %v273_v29  ;;  %vm280_vm0 = vweird.f32 %v1151_v33  ;;  %v1018_v29 = vor.u32 %v1127_v27, %v1017_v26 }
  0xc9   :  { %vm281_vm2 = vmor %vm279_vm1, %vm280_vm0 }
  0xca   :  { %v276_v37 = vsub.f32 1.0, %v275_v34  ;;  %726 = vmatpush.bf16.msra.mxu0 %v1018_v29  ;;  %v999_v34 = vld [vmem:[#allocation5 + $0x1bc] sm:$0xf0] }
  0xcc   :  { %v277_v39 = vmul.f32 %v1151_v33, %v276_v37  ;;  %v1002_v37 = vor.u32 %v1122_v32, %v999_v34 }
  0xce   :  { %v278_v41 = vadd.f32 %v1151_v33, %v277_v39  ;;  %v326_v39 = vld [vmem:[#allocation7 + $0x3] sm:$0x7]  ;;  %714 = vmatpush.bf16.msrb.mxu3 %v1002_v37 }
  0xcf   :  { %v329_v5 = vperm.slane %v326_v39, 0  ;;  %v330_v9 = vperm.slane %v326_v39, 1 }
  0xd0   :  { %v282_v44 = vsel %vm281_vm2, %v1151_v33, %v278_v41  ;;  %v998_v33 = vor.u32 %v1123_v31, %v997_v30  ;;  %v1120_v41 = vld [vmem:[#allocation5 + $0x1a0] sm:$0xf0] }
  0xd1   :  { %v287_v45 = vsel %vm284_vm3, %v286_v43, %v282_v44  ;;  %v986_v43 = vor.u32 %v1120_v41, %v985_v40  ;;  %v987_v44 = vld [vmem:[#allocation5 + $0x1a4] sm:$0xf0]  ;;  %v563_v40 = vperm.slane %v559_v24, 1 }
  0xd2   :  { %v290_v46 = vmul.f32 %v289_v42, %v287_v45  ;;  %701 = vmatpush.bf16.msrb.mxu2 %v998_v33  ;;  %v1119_v42 = vld [vmem:[#allocation5 + $0x19c] sm:$0xf]  ;;  %v993_v45 = vld [vmem:[#allocation5 + $0x1a0] sm:$0xf] }
  0xd4   :  { %v291_v47 = vadd.f32 %v290_v46, %v253_v36  ;;  %v1124_v36 = vld [vmem:[#allocation5 + $0x1c0] sm:$0xf0]  ;;  %v1121_v46 = vld [vmem:[#allocation5 + $0x1a8] sm:$0xf0] }
  0xd5   :  { %v1006_v38 = vor.u32 %v1124_v36, %v1005_v35  ;;  %v994_v49 = vor.u32 %v1121_v46, %v993_v45  ;;  %v562_v36 = vperm.slane %v559_v24, 0 }
  0xd6   :  { %v327_v48 = vpack.c.bf16 %v291_v47, %v291_v47  ;;  %v331_v47 = vperm.slane %v326_v39, 2  ;;  %702 = vmatpush.bf16.msrb.mxu2 %v986_v43 }
  0xd7   :  { %727 = vmatpush.bf16.msra.mxu0 %v1006_v38 }
  0xd8   :  { %471 = vmatmul.bf16.vlgmr.msra.gmra.mxu3 %v327_v48  ;;  %484 = vmatmul.bf16.vlgmr.msrb.gmra.mxu0 %v327_v48 }
  0xd9   :  { %497 = vmatmul.bf16.vlgmr.msrb.gmra.mxu1 %v327_v48  ;;  %v990_v48 = vor.u32 %v1119_v42, %v987_v44 }
  0xda   :  { %703 = vmatpush.bf16.msrb.mxu2 %v974_v55 }
  0xdb   :  { %715 = vmatpush.bf16.msrb.mxu3 %v990_v48  ;;  %728 = vmatpush.bf16.msra.mxu0 %v994_v49 }
  0xdf   :  { %716 = vmatpush.bf16.msrb.mxu3 %v978_v60  ;;  %729 = vmatpush.bf16.msra.mxu0 %v982_v61 }
 0x155   :  { %v485_v50 = vpop.f32.mrf.mxu0 }
 0x156   :  { %v498_v54 = vpop.f32.mrf.mxu1  ;;  %v486_v15 = vadd.f32 %v485_v50, %v330_v9 }
 0x157   :  { %v499_v59 = vadd.f32 %v498_v54, %v331_v47 }
 0x159   :  { %v970_v62 = vmul.f32 -1.442695, %v499_v59 }
 0x15b   :  { %1152 = vpow2.f32 %v970_v62  ;;  %v472_v63 = vpop.f32.mrf.mxu3 }
 0x15c   :  { %v473_v8 = vadd.f32 %v472_v63, %v329_v5 }
 0x15d   :  { %v487_v0 = vpop.f32.mrf.mxu0 }
 0x15e   :  { %v500_v1 = vpop.f32.mrf.mxu1  ;;  %v502_v12 = vmax.f32 %v473_v8, 0.0 }
 0x160   :  { %v522_v19 = vsub.f32 %v502_v12, %v486_v15 }
 0x161   :  { %v1153_v2 = vpop.eup %1152 }
 0x162   :  { %v506_v3 = vadd.f32 1.0, %v1153_v2 }
 0x163   :  { %v474_v4 = vpop.f32.mrf.mxu3 }
 0x164   :  { %1154 = vrcp.f32 %v506_v3  ;;  %v518_v11 = vand.u32 2147483648, %v506_v3  ;;  %v516_v14 = vand.u32 2147483647, %v506_v3  ;;  %vm512_vm5 = vweird.f32 %v506_v3 }
 0x166   :  { %v519_v17 = vor.u32 1.1754944e-38, %v518_v11  ;;  %vm517_vm7 = vcmp.eq.f32.partialorder %v516_v14, 8.507059e+37 }
 0x16a   :  { %v1155_v6 = vpop.eup %1154 }
 0x16b   :  { %v508_v7 = vmul.f32 %v1155_v6, %v506_v3  ;;  %vm513_vm4 = vweird.f32 %v1155_v6 }
 0x16c   :  { %vm514_vm6 = vmor %vm512_vm5, %vm513_vm4 }
 0x16d   :  { %v509_v10 = vsub.f32 1.0, %v508_v7 }
 0x16f   :  { %v510_v13 = vmul.f32 %v1155_v6, %v509_v10 }
 0x171   :  { %v511_v16 = vadd.f32 %v1155_v6, %v510_v13 }
 0x173   :  { %v515_v18 = vsel %vm514_vm6, %v1155_v6, %v511_v16 }
 0x174   :  { %v520_v20 = vsel %vm517_vm7, %v519_v17, %v515_v18 }
 0x175   :  { %v523_v21 = vmul.f32 %v522_v19, %v520_v20 }
 0x177   :  { %v524_v22 = vadd.f32 %v523_v21, %v486_v15 }
 0x179   :  { %v560_v23 = vpack.c.bf16 %v524_v22, %v524_v22 }
 0x17b   :  { %704 = vmatmul.bf16.vlgmr.msrb.gmra.mxu2 %v560_v23  ;;  %717 = vmatmul.bf16.vlgmr.msrb.gmra.mxu3 %v560_v23 }
 0x17c   :  { %730 = vmatmul.bf16.vlgmr.msra.gmra.mxu0 %v560_v23 }
 0x1f9   :  { %v731_v26 = vpop.f32.mrf.mxu0 }
 0x1fa   :  { %v732_v27 = vadd.f32 %v731_v26, %v564_v25 }
 0x1fc   :  { %v1067_v28 = vmul.f32 -1.442695, %v732_v27 }
 0x1fe   :  { %1156 = vpow2.f32 %v1067_v28  ;;  %v705_v29 = vpop.f32.mrf.mxu2  ;;  %v718_v30 = vpop.f32.mrf.mxu3 }
 0x1ff   :  { %v706_v39 = vadd.f32 %v705_v29, %v562_v36  ;;  %v719_v46 = vadd.f32 %v718_v30, %v563_v40 }
 0x201   :  { %v733_v31 = vpop.f32.mrf.mxu0  ;;  %v735_v43 = vmax.f32 %v706_v39, 0.0 }
 0x203   :  { %v755_v50 = vsub.f32 %v735_v43, %v719_v46 }
 0x204   :  { %v1157_v32 = vpop.eup %1156 }
 0x205   :  { %v739_v33 = vadd.f32 1.0, %v1157_v32 }
 0x206   :  { %v707_v34 = vpop.f32.mrf.mxu2  ;;  %v720_v35 = vpop.f32.mrf.mxu3 }
 0x207   :  { %1158 = vrcp.f32 %v739_v33  ;;  %v751_v42 = vand.u32 2147483648, %v739_v33  ;;  %v749_v45 = vand.u32 2147483647, %v739_v33  ;;  %vm745_vm9 = vweird.f32 %v739_v33 }
 0x209   :  { %v752_v48 = vor.u32 1.1754944e-38, %v751_v42  ;;  %vm750_vm11 = vcmp.eq.f32.partialorder %v749_v45, 8.507059e+37 }
 0x20d   :  { %v1159_v37 = vpop.eup %1158 }
 0x20e   :  { %v741_v38 = vmul.f32 %v1159_v37, %v739_v33  ;;  %vm746_vm8 = vweird.f32 %v1159_v37 }
 0x20f   :  { %vm747_vm10 = vmor %vm745_vm9, %vm746_vm8 }
 0x210   :  { %v742_v41 = vsub.f32 1.0, %v741_v38 }
 0x212   :  { %v743_v44 = vmul.f32 %v1159_v37, %v742_v41 }
 0x214   :  { %v744_v47 = vadd.f32 %v1159_v37, %v743_v44 }
 0x216   :  { %v748_v49 = vsel %vm747_vm10, %v1159_v37, %v744_v47 }
 0x217   :  { %v753_v51 = vsel %vm750_vm11, %v752_v48, %v748_v49 }
 0x218   :  { %v756_v52 = vmul.f32 %v755_v50, %v753_v51 }
 0x21a   :  { %v757_v53 = vadd.f32 %v756_v52, %v719_v46 }
 0x21c   :  { %758 = vst [vmem:[#allocation8] sm:$0xff] %v757_v53 }
 0x21d   :  { %769 = dma.vmem_to_hbm [thread:$0]  %s765_s2, 128, %s767_s5, [#allocation4]  }
 0x21e   :  { %1260 = dma.done.wait [#allocation4], 128  }
 0x21f   :  { %1261 = vsyncadd [#allocation4], 4294967168 }
 0x220   :  { %774 = vsyncpa [#allocation3], 1 }
 0x221   :  { %775 = vsyncpa [#allocation6], 1 }
 0x222   :  { %776 = vsyncpa [#allocation4], 1 }

</bundles_post_ra>
